<compile_context>
chip_gen: v7x
topology: tpu7x:2x2x1
jax: 0.10.0
libtpu: 0.0.40
codegen_flags: <defaults>
</compile_context>

<pallas_src>
import jax
import jax.numpy as jnp
from jax.experimental import pallas as pl
from jax.experimental.pallas import tpu as pltpu


# Bound on simultaneously in-flight segment DMAs inside the fused split kernel.
_MAX_INFLIGHT_DMAS = 8

# Compiled-call cache: one pallas_call per hdict sizing signature.
_SPLIT_CALL_CACHE = {}


def _make_split_kernel(offsets, sizes):
    """Kernel factory: for segment i, DMA h[offsets[i]:offsets[i]+sizes[i], :]
    straight from HBM into output i (also HBM).  DMAs are issued with a
    rolling window of _MAX_INFLIGHT_DMAS outstanding copies so many-segment
    splits stay HBM-bandwidth-bound rather than descriptor-issue-bound."""
    num = len(sizes)

    def kernel(h_ref, *refs):
        out_refs = refs[:num]       # num HBM output refs
        sem = refs[num]             # DMA semaphores, one per segment
        copies = []
        for i in range(num):        # static Python loop -> unrolled at trace time
            if i >= _MAX_INFLIGHT_DMAS:
                copies[i - _MAX_INFLIGHT_DMAS].wait()
            cp = pltpu.make_async_copy(
                h_ref.at[pl.ds(offsets[i], sizes[i]), :],
                out_refs[i],
                sem.at[i],
            )
            cp.start()
            copies.append(cp)
        # Drain the tail of the window.
        for cp in copies[max(0, num - _MAX_INFLIGHT_DMAS):]:
            cp.wait()

    return kernel


def _get_split_call(offsets, sizes, D, dtype):
    """Memoized builder for the fused HBM->HBM split pallas_call."""
    dt = jnp.dtype(dtype)
    key = (offsets, sizes, int(D), dt.name)
    fn = _SPLIT_CALL_CACHE.get(key)
    if fn is not None:
        return fn

    num = len(sizes)
    total_rows = sum(sizes)
    fn = pl.pallas_call(
        _make_split_kernel(offsets, sizes),
        out_shape=tuple(jax.ShapeDtypeStruct((n, D), dt) for n in sizes),
        # Raw HBM refs in and out; the kernel does pure DMA (no VMEM staging,
        # no vector stores -> D=32 lanes and odd row offsets are handled by
        # DMA address arithmetic only).
        in_specs=[pl.BlockSpec(memory_space=pl.ANY)],
        out_specs=tuple(pl.BlockSpec(memory_space=pl.ANY) for _ in sizes),
        scratch_shapes=[pltpu.SemaphoreType.DMA((num,))],
        # Pure copy: let XLA overlap this custom call with surrounding compute.
        cost_estimate=pl.CostEstimate(
            flops=0,
            transcendentals=0,
            bytes_accessed=2 * total_rows * D * dt.itemsize,
        ),
    )
    _SPLIT_CALL_CACHE[key] = fn
    return fn


class BaseModelPallas:
    """JAX/Pallas counterpart of the PyTorch BaseModel."""

    def forward(self, *args):
        # TODO(synk): abstract in the reference module (raises NotImplementedError).
        raise NotImplementedError

    def extra_loss(self):
        # TODO(synk): abstract in the reference module (raises NotImplementedError).
        raise NotImplementedError

    def get_emb(self):
        # TODO(synk): abstract in the reference module (raises NotImplementedError).
        raise NotImplementedError

    def h2dict(self, h, hdict, materialize=False):
        """Split h row-wise into segments sized by hdict values' leading dims.

        Exactly mirrors:
            pre = 0
            for i, value in hdict.items():
                out[i] = h[pre : value.shape[0] + pre]
                pre += value.shape[0]

        Default (materialize=False): copy-free static slices (jax.lax.slice)
        that XLA fuses into consumers — zero extra HBM traffic, no kernel
        launch.  This is the recommended path on all TPU generations.

        materialize=True: force per-key buffers to be materialized with one
        fused Pallas call that issues overlapped HBM->HBM DMAs (h read once,
        zero VMEM working set).

        Note: as in the PyTorch reference, rows past sum(sizes) are silently
        dropped.
        """
        N, D = h.shape
        keys = list(hdict.keys())
        if not keys:
            return {}

        sizes = [int(hdict[k].shape[0]) for k in keys]
        offsets = []
        pre = 0
        for n in sizes:
            offsets.append(pre)
            pre += n
        # Trace-time guard (DMA OOB would fault at runtime on the pallas path).
        assert pre <= N, f"hdict rows ({pre}) exceed h rows ({N})"

        if not materialize:
            # Copy-elimination path: static slices, fused by XLA into consumers.
            return {
                k: jax.lax.slice(h, (off, 0), (off + n, D))
                for k, off, n in zip(keys, offsets, sizes)
            }

        # Materialized path: single fused Pallas call over all non-empty
        # segments; zero-row segments are returned directly (no zero-size DMA).
        out = {}
        nonzero = [(k, off, n) for k, off, n in zip(keys, offsets, sizes) if n > 0]
        for k, off, n in zip(keys, offsets, sizes):
            if n == 0:
                out[k] = jnp.zeros((0, D), h.dtype)

        if nonzero:
            nz_offsets = tuple(off for _, off, _ in nonzero)
            nz_sizes = tuple(n for _, _, n in nonzero)
            call = _get_split_call(nz_offsets, nz_sizes, D, h.dtype)
            segs = call(h)
            for (k, _, _), seg in zip(nonzero, segs):
                out[k] = seg

        # Preserve hdict key order.
        return {k: out[k] for k in keys}


if __name__ == "__main__":
    key = jax.random.PRNGKey(0)
    k_h, k_a, k_b, k_c = jax.random.split(key, 4)

    # Small, deterministic example shapes: three node types with 3/5/8 rows,
    # hidden dim 32 -> stacked h is [16, 32].
    D = 32
    hdict = {
        "user": jax.random.normal(k_a, (3, D), dtype=jnp.float32),
        "item": jax.random.normal(k_b, (5, D), dtype=jnp.float32),
        "tag":  jax.random.normal(k_c, (8, D), dtype=jnp.float32),
    }
    N = sum(v.shape[0] for v in hdict.values())
    h = jax.random.normal(k_h, (N, D), dtype=jnp.float32)

    model = BaseModelPallas()

    # 1) Default copy-free path (static slices fused by XLA).
    out_slices = model.h2dict(h, hdict)
    out_slices = jax.tree_util.tree_map(jax.block_until_ready, out_slices)

    # 2) Materialized path: fused HBM->HBM DMA Pallas kernel.
    out_pallas = model.h2dict(h, hdict, materialize=True)
    out_pallas = jax.tree_util.tree_map(jax.block_until_ready, out_pallas)

    # Run the materialized path again to exercise the memoized compiled call.
    out_pallas2 = model.h2dict(h, hdict, materialize=True)
    out_pallas2 = jax.tree_util.tree_map(jax.block_until_ready, out_pallas2)

    # Reference check against plain slicing (same semantics as the PyTorch code).
    pre = 0
    for k_name, v in hdict.items():
        n = v.shape[0]
        ref = h[pre:pre + n]
        for tag, outs in (("slice", out_slices),
                          ("pallas", out_pallas),
                          ("pallas2", out_pallas2)):
            got = outs[k_name]
            assert got.shape == (n, D), (tag, got.shape, (n, D))
            assert jnp.allclose(got, ref), f"mismatch for segment {k_name} ({tag})"
        pre += n

    print("KERNEL_OK")
</pallas_src>

<mosaic_0001>
module attributes {stable_mosaic.version = 11 : i64} {
  func.func @kernel(%arg0: memref<16x32xf32, #tpu.memory_space<any>>, %arg1: memref<3x32xf32, #tpu.memory_space<any>>, %arg2: memref<5x32xf32, #tpu.memory_space<any>>, %arg3: memref<8x32xf32, #tpu.memory_space<any>>, %arg4: memref<3x!tpu.dma_semaphore, #tpu.memory_space<semaphore_mem>>) attributes {dimension_semantics = [], scalar_prefetch = 0 : i64, scratch_operands = 1 : i64, tpu.core_type = #tpu.core_type<tc>} {
    %c0_i32 = arith.constant 0 : i32
    %c0_i32_0 = arith.constant 0 : i32
    %c0_i32_1 = arith.constant 0 : i32
    %0 = tpu.memref_slice %arg0[%c0_i32_0, %c0_i32_1] : memref<16x32xf32, #tpu.memory_space<any>> -> memref<3x32xf32, #tpu.memory_space<any>>
    %1 = tpu.memref_slice %arg4[%c0_i32] : memref<3x!tpu.dma_semaphore, #tpu.memory_space<semaphore_mem>> -> memref<1x!tpu.dma_semaphore, #tpu.memory_space<semaphore_mem>>
    %2 = tpu.memref_squeeze %1 : memref<1x!tpu.dma_semaphore, #tpu.memory_space<semaphore_mem>> -> memref<!tpu.dma_semaphore, #tpu.memory_space<semaphore_mem>>
    tpu.enqueue_dma source(%0 : memref<3x32xf32, #tpu.memory_space<any>>) target(%arg1 : memref<3x32xf32, #tpu.memory_space<any>>) target_semaphore(%2 : memref<!tpu.dma_semaphore, #tpu.memory_space<semaphore_mem>>)
    %c1_i32 = arith.constant 1 : i32
    %c3_i32 = arith.constant 3 : i32
    %c0_i32_2 = arith.constant 0 : i32
    %3 = tpu.memref_slice %arg0[%c3_i32, %c0_i32_2] : memref<16x32xf32, #tpu.memory_space<any>> -> memref<5x32xf32, #tpu.memory_space<any>>
    %4 = tpu.memref_slice %arg4[%c1_i32] : memref<3x!tpu.dma_semaphore, #tpu.memory_space<semaphore_mem>> -> memref<1x!tpu.dma_semaphore, #tpu.memory_space<semaphore_mem>>
    %5 = tpu.memref_squeeze %4 : memref<1x!tpu.dma_semaphore, #tpu.memory_space<semaphore_mem>> -> memref<!tpu.dma_semaphore, #tpu.memory_space<semaphore_mem>>
    tpu.enqueue_dma source(%3 : memref<5x32xf32, #tpu.memory_space<any>>) target(%arg2 : memref<5x32xf32, #tpu.memory_space<any>>) target_semaphore(%5 : memref<!tpu.dma_semaphore, #tpu.memory_space<semaphore_mem>>)
    %c2_i32 = arith.constant 2 : i32
    %c8_i32 = arith.constant 8 : i32
    %c0_i32_3 = arith.constant 0 : i32
    %6 = tpu.memref_slice %arg0[%c8_i32, %c0_i32_3] : memref<16x32xf32, #tpu.memory_space<any>> -> memref<8x32xf32, #tpu.memory_space<any>>
    %7 = tpu.memref_slice %arg4[%c2_i32] : memref<3x!tpu.dma_semaphore, #tpu.memory_space<semaphore_mem>> -> memref<1x!tpu.dma_semaphore, #tpu.memory_space<semaphore_mem>>
    %8 = tpu.memref_squeeze %7 : memref<1x!tpu.dma_semaphore, #tpu.memory_space<semaphore_mem>> -> memref<!tpu.dma_semaphore, #tpu.memory_space<semaphore_mem>>
    tpu.enqueue_dma source(%6 : memref<8x32xf32, #tpu.memory_space<any>>) target(%arg3 : memref<8x32xf32, #tpu.memory_space<any>>) target_semaphore(%8 : memref<!tpu.dma_semaphore, #tpu.memory_space<semaphore_mem>>)
    %c0_i32_4 = arith.constant 0 : i32
    %c0_i32_5 = arith.constant 0 : i32
    %c0_i32_6 = arith.constant 0 : i32
    %9 = tpu.memref_slice %arg0[%c0_i32_5, %c0_i32_6] : memref<16x32xf32, #tpu.memory_space<any>> -> memref<3x32xf32, #tpu.memory_space<any>>
    %10 = tpu.memref_slice %arg4[%c0_i32_4] : memref<3x!tpu.dma_semaphore, #tpu.memory_space<semaphore_mem>> -> memref<1x!tpu.dma_semaphore, #tpu.memory_space<semaphore_mem>>
    %11 = tpu.memref_squeeze %10 : memref<1x!tpu.dma_semaphore, #tpu.memory_space<semaphore_mem>> -> memref<!tpu.dma_semaphore, #tpu.memory_space<semaphore_mem>>
    tpu.wait_dma2 semaphore(%11 : memref<!tpu.dma_semaphore, #tpu.memory_space<semaphore_mem>>) src(%9 : memref<3x32xf32, #tpu.memory_space<any>>) dst(%arg1 : memref<3x32xf32, #tpu.memory_space<any>>)
    %c1_i32_7 = arith.constant 1 : i32
    %c3_i32_8 = arith.constant 3 : i32
    %c0_i32_9 = arith.constant 0 : i32
    %12 = tpu.memref_slice %arg0[%c3_i32_8, %c0_i32_9] : memref<16x32xf32, #tpu.memory_space<any>> -> memref<5x32xf32, #tpu.memory_space<any>>
    %13 = tpu.memref_slice %arg4[%c1_i32_7] : memref<3x!tpu.dma_semaphore, #tpu.memory_space<semaphore_mem>> -> memref<1x!tpu.dma_semaphore, #tpu.memory_space<semaphore_mem>>
    %14 = tpu.memref_squeeze %13 : memref<1x!tpu.dma_semaphore, #tpu.memory_space<semaphore_mem>> -> memref<!tpu.dma_semaphore, #tpu.memory_space<semaphore_mem>>
    tpu.wait_dma2 semaphore(%14 : memref<!tpu.dma_semaphore, #tpu.memory_space<semaphore_mem>>) src(%12 : memref<5x32xf32, #tpu.memory_space<any>>) dst(%arg2 : memref<5x32xf32, #tpu.memory_space<any>>)
    %c2_i32_10 = arith.constant 2 : i32
    %c8_i32_11 = arith.constant 8 : i32
    %c0_i32_12 = arith.constant 0 : i32
    %15 = tpu.memref_slice %arg0[%c8_i32_11, %c0_i32_12] : memref<16x32xf32, #tpu.memory_space<any>> -> memref<8x32xf32, #tpu.memory_space<any>>
    %16 = tpu.memref_slice %arg4[%c2_i32_10] : memref<3x!tpu.dma_semaphore, #tpu.memory_space<semaphore_mem>> -> memref<1x!tpu.dma_semaphore, #tpu.memory_space<semaphore_mem>>
    %17 = tpu.memref_squeeze %16 : memref<1x!tpu.dma_semaphore, #tpu.memory_space<semaphore_mem>> -> memref<!tpu.dma_semaphore, #tpu.memory_space<semaphore_mem>>
    tpu.wait_dma2 semaphore(%17 : memref<!tpu.dma_semaphore, #tpu.memory_space<semaphore_mem>>) src(%15 : memref<8x32xf32, #tpu.memory_space<any>>) dst(%arg3 : memref<8x32xf32, #tpu.memory_space<any>>)
    return
  }
}

</mosaic_0001>

<bundles_post_ra>
// kernel: tpu_custom_call.1
= control target key start
LH: loop header
LB: loop body
LE: loop exit
PB: predicated region body
PF: predicated region fallthrough
CT: control target
= control target key end

     0   :  { %s97_s15 = smov [#allocation2]   ;;  %s98_s16 = smov [#allocation3]   ;;  %s142_s0 = inlined_call_operand.hbm [shape: f32[16,32], index: 0, kind: input, shape index: {}]   ;;  %s143_s1 = inlined_call_operand.hbm [shape: f32[3,32], index: 1, kind: output, shape index: {0}]   ;;  %s144_s2 = inlined_call_operand.hbm [shape: f32[5,32], index: 2, kind: output, shape index: {1}]   ;;  %s145_s3 = inlined_call_operand.hbm [shape: f32[8,32], index: 3, kind: output, shape index: {2}]  }
   0x1   :  { %s22_s14 = scalar_lea.hbm %s142_s0, 48  ;;  %s99_s17 = smov 0  }
   0x2   :  { %21 = dma.general %s142_s0, 48, %s143_s1, %s97_s15, %s98_s16, [#allocation4], %s99_s17, 0  }
   0x3   :  { %s37_s24 = scalar_lea.hbm %s142_s0, 128  ;;  %s100_s25 = smov [#allocation2 + $0x1]  }
   0x4   :  { %s101_s26 = smov [#allocation5]   ;;  %s102_s29 = smov [#allocation2 + $0x2]  }
   0x5   :  { %36 = dma.general %s22_s14, 80, %s144_s2, %s100_s25, %s101_s26, [#allocation6], %s99_s17, 0  }
   0x6   :  { %s103_s30 = smov [#allocation7]  }
   0x7   :  { %51 = dma.general %s37_s24, 128, %s145_s3, %s102_s29, %s103_s30, [#allocation8], %s99_s17, 0  }
   0x8   :  { %91 = dma.done.wait [#allocation2], 48 }
   0x9   :  { %92 = vsyncadd [#allocation2], 4294967248 }
   0xa   :  { %93 = dma.done.wait [#allocation2 + $0x1], 80 }
   0xb   :  { %94 = vsyncadd [#allocation2 + $0x1], 4294967216 }
   0xc   :  { %95 = dma.done.wait [#allocation2 + $0x2], 128 }
   0xd   :  { %96 = vsyncadd [#allocation2 + $0x2], 4294967168 }
   0xe   :  { %61 = vsyncmov [#allocation2] }
  0x11   :  { %s62_s0 = vpop.sfrf %61 }
  0x12   :  { %p81_p0 = scmp.ne.s32.totalorder %s62_s0, 0 }
  0x14   :  { %66 = shalt.err (%p81_p0)  }
  0x15   :  { %68 = vsyncmov [#allocation2 + $0x1] }
  0x18   :  { %s69_s1 = vpop.sfrf %68 }
  0x19   :  { %p82_p1 = scmp.ne.s32.totalorder %s69_s1, 0 }
  0x1b   :  { %73 = shalt.err (%p82_p1)  }
  0x1c   :  { %75 = vsyncmov [#allocation2 + $0x2] }
  0x1f   :  { %s76_s2 = vpop.sfrf %75 }
  0x20   :  { %p83_p2 = scmp.ne.s32.totalorder %s76_s2, 0 }
  0x22   :  { %80 = shalt.err (%p83_p2)  }

</bundles_post_ra>
